<compile_context>
chip_gen: v6e
topology: v6e:2x2x1
jax: 0.10.0
libtpu: 0.0.40
codegen_flags: <defaults>
</compile_context>

<pallas_src>
import functools
import math

import jax
import jax.numpy as jnp
from jax.experimental import pallas as pl
from jax.experimental.pallas import tpu as pltpu

LANE = 128
NEG_INF = -1e30  # padded output-lane bias -> exp underflows to exactly 0


def _round_up(x, m):
    return (x + m - 1) // m * m


def _cdiv(a, b):
    return -(-a // b)


def net3_kernel(x_ref, w1_ref, b1_ref, w2_ref, b2_ref, w3_ref, b3_ref, o_ref):
    # MXU operands in bf16 (single-pass), accumulate + elementwise in f32.
    x = x_ref[...].astype(jnp.bfloat16)
    h = jnp.dot(x, w1_ref[...], preferred_element_type=jnp.float32) + b1_ref[...]
    h = jnp.dot(h.astype(jnp.bfloat16), w2_ref[...],
                preferred_element_type=jnp.float32) + b2_ref[...]
    h = jnp.maximum(h, 0.0)  # ReLU (f32, VPU)
    logits = jnp.dot(h.astype(jnp.bfloat16), w3_ref[...],
                     preferred_element_type=jnp.float32) + b3_ref[...]
    # Numerically stable softmax over the feature axis (PyTorch dim=1).
    # Padded output lanes carry NEG_INF bias -> exp == 0 -> excluded from sum.
    m = jnp.max(logits, axis=1, keepdims=True)
    e = jnp.exp(logits - m)
    denom = jnp.sum(e, axis=1, keepdims=True)
    # EUP fast reciprocal + one Newton-Raphson step (near-f32 accuracy).
    r = pl.reciprocal(denom, approx=True)
    r = r * (2.0 - denom * r)
    o_ref[...] = (e * r).astype(o_ref.dtype)


def prepare_params(params):
    """One-time padding / casting of weights (hoisted out of the forward path).

    Weights are lane-padded and cast to bf16 for single-pass MXU matmuls;
    biases stay f32. Padded lanes of the output bias are NEG_INF so the
    softmax ignores them.
    """
    w1, b1, w2, b2, w3, b3 = params
    K, H = w1.shape
    O = w3.shape[1]
    Hp = _round_up(H, LANE)
    Op = _round_up(O, LANE)

    w1p = jnp.zeros((K, Hp), jnp.bfloat16).at[:, :H].set(w1.astype(jnp.bfloat16))
    b1p = jnp.zeros((1, Hp), jnp.float32).at[:, :H].set(b1)
    w2p = jnp.zeros((Hp, Hp), jnp.bfloat16).at[:H, :H].set(w2.astype(jnp.bfloat16))
    b2p = jnp.zeros((1, Hp), jnp.float32).at[:, :H].set(b2)
    w3p = jnp.zeros((Hp, Op), jnp.bfloat16).at[:H, :O].set(w3.astype(jnp.bfloat16))
    b3p = jnp.full((1, Op), NEG_INF, jnp.float32).at[:, :O].set(b3)
    return (w1p, b1p, w2p, b2p, w3p, b3p), (K, H, O)


@functools.partial(jax.jit, static_argnames=("out_features", "batch_tile"))
def net3_forward(x, padded_params, *, out_features, batch_tile=4096):
    w1p, b1p, w2p, b2p, w3p, b3p = padded_params
    B, K = x.shape
    Hp = w1p.shape[1]
    Op = w3p.shape[1]
    O = out_features

    # --- Batch tiling -------------------------------------------------------
    # * Avoid the ~2x padding cliff: pick TB so Bp/B stays close to 1.
    # * Prefer >= 2 grid steps when the batch allows it so the "parallel" grid
    #   axis can be sharded across both TensorCores on v7x.
    B8 = _round_up(B, 8)
    n_steps = max(_cdiv(B8, batch_tile), 2 if B8 >= 16 else 1)
    TB = _round_up(_cdiv(B8, n_steps), 8)
    Bp = _round_up(B8, TB)
    grid = (Bp // TB,)

    # Only pad the batch dim of x (no lane padding of K).
    if Bp == B and x.dtype == jnp.float32:
        xp = x
    else:
        xp = jnp.zeros((Bp, K), jnp.float32).at[:B, :].set(x.astype(jnp.float32))

    flops = 2 * Bp * (K * Hp + Hp * Hp + Hp * Op)
    bytes_accessed = (4 * Bp * K                     # x (f32)
                      + 2 * (K * Hp + Hp * Hp + Hp * Op)   # bf16 weights
                      + 4 * (2 * Hp + Op)            # biases
                      + 4 * Bp * Op)                 # output (f32)
    transcendentals = Bp * Op + Bp  # exp per logit + reciprocal per row

    out = pl.pallas_call(
        net3_kernel,
        out_shape=jax.ShapeDtypeStruct((Bp, Op), jnp.float32),
        grid=grid,
        in_specs=[
            # Batch-tiled activation; last block dim == full K (legal even if K<128).
            pl.BlockSpec((TB, K), lambda i: (i, 0)),
            # Weights/biases: constant block index -> VMEM-resident across steps.
            pl.BlockSpec((K, Hp), lambda i: (0, 0)),
            pl.BlockSpec((1, Hp), lambda i: (0, 0)),
            pl.BlockSpec((Hp, Hp), lambda i: (0, 0)),
            pl.BlockSpec((1, Hp), lambda i: (0, 0)),
            pl.BlockSpec((Hp, Op), lambda i: (0, 0)),
            pl.BlockSpec((1, Op), lambda i: (0, 0)),
        ],
        out_specs=pl.BlockSpec((TB, Op), lambda i: (i, 0)),
        compiler_params=pltpu.CompilerParams(
            dimension_semantics=("parallel",),  # megacore sharding on v7x
            vmem_limit_bytes=32 * 1024 * 1024,
        ),
        cost_estimate=pl.CostEstimate(
            flops=flops,
            transcendentals=transcendentals,
            bytes_accessed=bytes_accessed,
        ),
    )(xp, w1p, b1p, w2p, b2p, w3p, b3p)

    # Strip batch padding and padded output lanes. (A padded consumer could
    # skip this slice to save one HBM pass.)
    return out[:B, :O]


def init_linear(key, in_features, out_features):
    # PyTorch nn.Linear default init: U(-1/sqrt(fan_in), 1/sqrt(fan_in)).
    kw, kb = jax.random.split(key)
    bound = 1.0 / math.sqrt(in_features)
    # Stored transposed: (in_features, out_features) so the kernel computes x @ W + b.
    w = jax.random.uniform(kw, (in_features, out_features), jnp.float32, -bound, bound)
    b = jax.random.uniform(kb, (1, out_features), jnp.float32, -bound, bound)
    return w, b


def reference_forward(x, params):
    w1, b1, w2, b2, w3, b3 = params
    h = x @ w1 + b1
    h = h @ w2 + b2
    h = jnp.maximum(h, 0.0)
    logits = h @ w3 + b3
    return jax.nn.softmax(logits, axis=1)


if __name__ == "__main__":
    key = jax.random.PRNGKey(0)
    k_x, k1, k2, k3 = jax.random.split(key, 4)

    batch = 8
    input_size = 32
    nodes = 64
    output_size = 16

    x = jax.random.normal(k_x, (batch, input_size), jnp.float32)
    w1, b1 = init_linear(k1, input_size, nodes)
    w2, b2 = init_linear(k2, nodes, nodes)
    w3, b3 = init_linear(k3, nodes, output_size)
    params = (w1, b1, w2, b2, w3, b3)

    # One-time weight padding / bf16 cast (hoisted out of the forward path).
    padded_params, (_, _, O) = prepare_params(params)

    out = net3_forward(x, padded_params, out_features=O)
    out = jax.block_until_ready(out)

    ref = reference_forward(x, params)
    assert out.shape == (batch, output_size)
    # bf16 MXU operands -> tolerance loosened vs. pure-f32 reference.
    assert jnp.allclose(out, ref, atol=1e-2, rtol=1e-2), "mismatch vs reference"
    assert jnp.allclose(jnp.sum(out, axis=1), 1.0, atol=1e-3), "rows must sum to 1"

    print("KERNEL_OK")
</pallas_src>

<mosaic_0001>
module attributes {stable_mosaic.version = 11 : i64} {
  func.func @net3_kernel(%arg0: i32, %arg1: memref<8x32xf32, #tpu.memory_space<vmem>>, %arg2: memref<32x128xbf16, #tpu.memory_space<vmem>>, %arg3: memref<1x128xf32, #tpu.memory_space<vmem>>, %arg4: memref<128x128xbf16, #tpu.memory_space<vmem>>, %arg5: memref<1x128xf32, #tpu.memory_space<vmem>>, %arg6: memref<128x128xbf16, #tpu.memory_space<vmem>>, %arg7: memref<1x128xf32, #tpu.memory_space<vmem>>, %arg8: memref<8x128xf32, #tpu.memory_space<vmem>>) attributes {dimension_semantics = [#tpu.dimension_semantics<parallel>], iteration_bounds = array<i64: 1>, scalar_prefetch = 0 : i64, scratch_operands = 0 : i64, tpu.core_type = #tpu.core_type<tc>, window_params = [{transform_indices = @transform_0, window_bounds = array<i64: 8, 32>}, {pipeline_mode = #tpu.pipeline_mode<synchronous>, transform_indices = @transform_1, window_bounds = array<i64: 32, 128>}, {pipeline_mode = #tpu.pipeline_mode<synchronous>, transform_indices = @transform_2, window_bounds = array<i64: 1, 128>}, {pipeline_mode = #tpu.pipeline_mode<synchronous>, transform_indices = @transform_3, window_bounds = array<i64: 128, 128>}, {pipeline_mode = #tpu.pipeline_mode<synchronous>, transform_indices = @transform_4, window_bounds = array<i64: 1, 128>}, {pipeline_mode = #tpu.pipeline_mode<synchronous>, transform_indices = @transform_5, window_bounds = array<i64: 128, 128>}, {pipeline_mode = #tpu.pipeline_mode<synchronous>, transform_indices = @transform_6, window_bounds = array<i64: 1, 128>}, {transform_indices = @transform_7, window_bounds = array<i64: 8, 128>}]} {
    %c0 = arith.constant 0 : index
    %c0_0 = arith.constant 0 : index
    %0 = vector.load %arg1[%c0, %c0_0] : memref<8x32xf32, #tpu.memory_space<vmem>>, vector<8x32xf32>
    %1 = arith.truncf %0 : vector<8x32xf32> to vector<8x32xbf16>
    %c0_1 = arith.constant 0 : index
    %c0_2 = arith.constant 0 : index
    %2 = vector.load %arg2[%c0_1, %c0_2] : memref<32x128xbf16, #tpu.memory_space<vmem>>, vector<32x128xbf16>
    %cst = arith.constant dense<0.000000e+00> : vector<8x128xf32>
    %3 = tpu.matmul %1, %2, %cst {dimension_numbers = #tpu.dot_dimension_numbers<[1], [0], [0], [1], [0, 0, 1, 1], [], []>} : vector<8x32xbf16>, vector<32x128xbf16>, vector<8x128xf32> -> vector<8x128xf32>
    %c0_3 = arith.constant 0 : index
    %c0_4 = arith.constant 0 : index
    %4 = vector.load %arg3[%c0_3, %c0_4] : memref<1x128xf32, #tpu.memory_space<vmem>>, vector<1x128xf32>
    %5 = vector.broadcast %4 : vector<1x128xf32> to vector<8x128xf32>
    %6 = arith.addf %3, %5 : vector<8x128xf32>
    %7 = arith.truncf %6 : vector<8x128xf32> to vector<8x128xbf16>
    %c0_5 = arith.constant 0 : index
    %c0_6 = arith.constant 0 : index
    %8 = vector.load %arg4[%c0_5, %c0_6] : memref<128x128xbf16, #tpu.memory_space<vmem>>, vector<128x128xbf16>
    %cst_7 = arith.constant dense<0.000000e+00> : vector<8x128xf32>
    %9 = tpu.matmul %7, %8, %cst_7 {dimension_numbers = #tpu.dot_dimension_numbers<[1], [0], [0], [1], [0, 0, 1, 1], [], []>} : vector<8x128xbf16>, vector<128x128xbf16>, vector<8x128xf32> -> vector<8x128xf32>
    %c0_8 = arith.constant 0 : index
    %c0_9 = arith.constant 0 : index
    %10 = vector.load %arg5[%c0_8, %c0_9] : memref<1x128xf32, #tpu.memory_space<vmem>>, vector<1x128xf32>
    %11 = vector.broadcast %10 : vector<1x128xf32> to vector<8x128xf32>
    %12 = arith.addf %9, %11 : vector<8x128xf32>
    %cst_10 = arith.constant 0.000000e+00 : f32
    %13 = vector.broadcast %cst_10 : f32 to vector<8x128xf32>
    %14 = arith.maximumf %12, %13 : vector<8x128xf32>
    %15 = arith.truncf %14 : vector<8x128xf32> to vector<8x128xbf16>
    %c0_11 = arith.constant 0 : index
    %c0_12 = arith.constant 0 : index
    %16 = vector.load %arg6[%c0_11, %c0_12] : memref<128x128xbf16, #tpu.memory_space<vmem>>, vector<128x128xbf16>
    %cst_13 = arith.constant dense<0.000000e+00> : vector<8x128xf32>
    %17 = tpu.matmul %15, %16, %cst_13 {dimension_numbers = #tpu.dot_dimension_numbers<[1], [0], [0], [1], [0, 0, 1, 1], [], []>} : vector<8x128xbf16>, vector<128x128xbf16>, vector<8x128xf32> -> vector<8x128xf32>
    %c0_14 = arith.constant 0 : index
    %c0_15 = arith.constant 0 : index
    %18 = vector.load %arg7[%c0_14, %c0_15] : memref<1x128xf32, #tpu.memory_space<vmem>>, vector<1x128xf32>
    %19 = vector.broadcast %18 : vector<1x128xf32> to vector<8x128xf32>
    %20 = arith.addf %17, %19 : vector<8x128xf32>
    %cst_16 = arith.constant dense<0xFF800000> : vector<8xf32>
    %21 = vector.multi_reduction <maximumf>, %20, %cst_16 [1] : vector<8x128xf32> to vector<8xf32>
    %22 = vector.shape_cast %21 : vector<8xf32> to vector<8x1xf32>
    %23 = vector.broadcast %22 : vector<8x1xf32> to vector<8x128xf32>
    %24 = arith.subf %20, %23 : vector<8x128xf32>
    %25 = math.exp %24 : vector<8x128xf32>
    %cst_17 = arith.constant dense<0.000000e+00> : vector<8xf32>
    %26 = vector.multi_reduction <add>, %25, %cst_17 [1] : vector<8x128xf32> to vector<8xf32>
    %27 = vector.shape_cast %26 : vector<8xf32> to vector<8x1xf32>
    %28 = tpu.reciprocal %27 {approx = true} : vector<8x1xf32> -> vector<8x1xf32>
    %29 = arith.mulf %27, %28 : vector<8x1xf32>
    %cst_18 = arith.constant 2.000000e+00 : f32
    %30 = vector.broadcast %cst_18 : f32 to vector<8x1xf32>
    %31 = arith.subf %30, %29 : vector<8x1xf32>
    %32 = arith.mulf %28, %31 : vector<8x1xf32>
    %33 = vector.broadcast %32 : vector<8x1xf32> to vector<8x128xf32>
    %34 = arith.mulf %25, %33 : vector<8x128xf32>
    %c0_19 = arith.constant 0 : index
    %c0_20 = arith.constant 0 : index
    %35 = vector.load %arg8[%c0_19, %c0_20] : memref<8x128xf32, #tpu.memory_space<vmem>>, vector<8x128xf32>
    tpu.vector_store %arg8[%c0_19, %c0_20], %34 {strides = array<i32>} : memref<8x128xf32, #tpu.memory_space<vmem>>, vector<8x128xf32>,
    return
  }
  func.func @transform_0(%arg0: i32) -> (i32, i32) {
    %c0_i32 = arith.constant 0 : i32
    %c0_i32_0 = arith.constant 0 : i32
    return %arg0, %c0_i32 : i32, i32
  }
  func.func @transform_1(%arg0: i32) -> (i32, i32) {
    %c0_i32 = arith.constant 0 : i32
    %c0_i32_0 = arith.constant 0 : i32
    %c0_i32_1 = arith.constant 0 : i32
    return %c0_i32, %c0_i32_0 : i32, i32
  }
  func.func @transform_2(%arg0: i32) -> (i32, i32) {
    %c0_i32 = arith.constant 0 : i32
    %c0_i32_0 = arith.constant 0 : i32
    %c0_i32_1 = arith.constant 0 : i32
    return %c0_i32, %c0_i32_0 : i32, i32
  }
  func.func @transform_3(%arg0: i32) -> (i32, i32) {
    %c0_i32 = arith.constant 0 : i32
    %c0_i32_0 = arith.constant 0 : i32
    %c0_i32_1 = arith.constant 0 : i32
    return %c0_i32, %c0_i32_0 : i32, i32
  }
  func.func @transform_4(%arg0: i32) -> (i32, i32) {
    %c0_i32 = arith.constant 0 : i32
    %c0_i32_0 = arith.constant 0 : i32
    %c0_i32_1 = arith.constant 0 : i32
    return %c0_i32, %c0_i32_0 : i32, i32
  }
  func.func @transform_5(%arg0: i32) -> (i32, i32) {
    %c0_i32 = arith.constant 0 : i32
    %c0_i32_0 = arith.constant 0 : i32
    %c0_i32_1 = arith.constant 0 : i32
    return %c0_i32, %c0_i32_0 : i32, i32
  }
  func.func @transform_6(%arg0: i32) -> (i32, i32) {
    %c0_i32 = arith.constant 0 : i32
    %c0_i32_0 = arith.constant 0 : i32
    %c0_i32_1 = arith.constant 0 : i32
    return %c0_i32, %c0_i32_0 : i32, i32
  }
  func.func @transform_7(%arg0: i32) -> (i32, i32) {
    %c0_i32 = arith.constant 0 : i32
    %c0_i32_0 = arith.constant 0 : i32
    return %arg0, %c0_i32 : i32, i32
  }
}

</mosaic_0001>

<bundles_post_ra>
// kernel: net3_forward.1
= control target key start
LH: loop header
LB: loop body
LE: loop exit
PB: predicated region body
PF: predicated region fallthrough
CT: control target
= control target key end

     0   :  { %12 = vsyncpa [#allocation3], 0  ;;  %s741_s0 = inlined_call_operand.hbm [shape: f32[8,32], index: 0, kind: input, shape index: {}]   ;;  %s742_s1 = inlined_call_operand.hbm [shape: bf16[32,128], index: 1, kind: input, shape index: {}]   ;;  %s743_s2 = inlined_call_operand.vmem [shape: f32[1,128], index: 2, kind: input, shape index: {}]   ;;  %s744_s3 = inlined_call_operand.hbm [shape: bf16[128,128], index: 3, kind: input, shape index: {}]   ;;  %s745_s4 = inlined_call_operand.vmem [shape: f32[1,128], index: 4, kind: input, shape index: {}]   ;;  %s746_s5 = inlined_call_operand.hbm [shape: bf16[128,128], index: 5, kind: input, shape index: {}]   ;;  %s747_s6 = inlined_call_operand.vmem [shape: f32[1,128], index: 6, kind: input, shape index: {}]   ;;  %s748_s7 = inlined_call_operand.hbm [shape: f32[8,128], index: 7, kind: output, shape index: {}]  }
   0x1   :  { %13 = vsyncpa [#allocation6], 0 }
   0x2   :  { %14 = vsyncpa [#allocation9], 0 }
   0x3   :  { %15 = vsyncpa [#allocation4], 0  ;;  %s635_s24 = smov [#allocation5]  }
   0x4   :  { %s31_s25 = sshll.u32 %s635_s24, 4  ;;  %s32_s25 = int_to_ptr.vmem [resolvable:$true] %s31_s25 }
   0x5   :  { %s535_s26 = scalar_lea.vmem %s32_s25, 256  ;;  %p540_p1 = scmp.lt.s32.totalorder %s32_s25, %s32_s25 }
   0x6   :  { %p536_p0 = scmp.ne.s32.totalorder %s32_s25, %s535_s26  ;;  %p541_p2 = scmp.lt.s32.totalorder %s535_s26, %s535_s26 }
   0x8   :  { %p542_p3 = por %p541_p2, %p540_p1 }
   0xa   :  { %p543_p4 = pnand %p542_p3, %p536_p0 }
   0xc   :  { %546 = shalt.err (!%p543_p4)
}
   0xd   :  { %s636_s27 = smov 64   ;;  %s637_s28 = smov 4  }
   0xe   :  { %37 = dma.hbm_to_vmem [thread:$0]  %s742_s1, 256, %s32_s25, [#allocation6], %s636_s27, %s636_s27, %s637_s28  }
   0xf   :  { %s638_s8 = smov [#allocation2]   ;;  %s639_s10 = smov [#allocation7]  }
  0x10   :  { %s22_s9 = sshll.u32 %s638_s8, 4  ;;  %s45_s11 = sshll.u32 %s639_s10, 4  ;;  %s23_s9 = int_to_ptr.vmem [resolvable:$true] %s22_s9  ;;  %s46_s11 = int_to_ptr.vmem [resolvable:$true] %s45_s11 }
  0x11   :  { %s555_s12 = scalar_lea.vmem %s23_s9, 128  ;;  %p560_p6 = scmp.lt.s32.totalorder %s23_s9, %s23_s9 }
  0x12   :  { %p556_p5 = scmp.ne.s32.totalorder %s23_s9, %s555_s12  ;;  %p561_p7 = scmp.lt.s32.totalorder %s555_s12, %s555_s12 }
  0x14   :  { %p562_p8 = por %p561_p7, %p560_p6 }
  0x16   :  { %p563_p9 = pnand %p562_p8, %p556_p5 }
  0x18   :  { %566 = shalt.err (!%p563_p9)
}
  0x19   :  { %25 = dma.hbm_to_vmem [thread:$0]  %s741_s0, 128, %s23_s9, [#allocation3]  }
  0x1a   :  { %s575_s15 = scalar_lea.vmem %s46_s11, 1024  ;;  %p580_p11 = scmp.lt.s32.totalorder %s46_s11, %s46_s11 }
  0x1b   :  { %p576_p10 = scmp.ne.s32.totalorder %s46_s11, %s575_s15  ;;  %p581_p12 = scmp.lt.s32.totalorder %s575_s15, %s575_s15 }
  0x1d   :  { %p582_p13 = por %p581_p12, %p580_p11 }
  0x1f   :  { %p583_p0 = pnand %p582_p13, %p576_p10 }
  0x21   :  { %586 = shalt.err (!%p583_p0)
}
  0x22   :  { %51 = dma.hbm_to_vmem [thread:$0]  %s744_s3, 1024, %s46_s11, [#allocation6], %s636_s27, %s636_s27, %s637_s28  }
  0x23   :  { %s640_s17 = smov [#allocation8]  }
  0x24   :  { %s59_s18 = sshll.u32 %s640_s17, 4  ;;  %s60_s18 = int_to_ptr.vmem [resolvable:$true] %s59_s18 }
  0x25   :  { %s595_s19 = scalar_lea.vmem %s60_s18, 1024  ;;  %p600_p2 = scmp.lt.s32.totalorder %s60_s18, %s60_s18 }
  0x26   :  { %p596_p1 = scmp.ne.s32.totalorder %s60_s18, %s595_s19  ;;  %p601_p3 = scmp.lt.s32.totalorder %s595_s19, %s595_s19 }
  0x28   :  { %p602_p4 = por %p601_p3, %p600_p2 }
  0x2a   :  { %p603_p5 = pnand %p602_p4, %p596_p1 }
  0x2c   :  { %606 = shalt.err (!%p603_p5)
}
  0x2d   :  { %65 = dma.hbm_to_vmem [thread:$0]  %s746_s5, 1024, %s60_s18, [#allocation9], %s636_s27, %s636_s27, %s637_s28  }
  0x2e   :  { %627 = dma.done.wait [#allocation3], 128  }
  0x2f   :  { %628 = vsyncadd [#allocation3], 4294967168 }
  0x30   :  { %629 = dma.done.wait [#allocation6], 1280  }
  0x31   :  { %630 = vsyncadd [#allocation6], 4294966016 }
  0x32   :  { %631 = dma.done.wait [#allocation9], 1024  }
  0x33   :  { %632 = vsyncadd [#allocation9], 4294966272  ;;  %v641_v0 = vmov 0.0   ;;  %vm642_vm0 = vmmov 0   ;;  %v505_v1 = vld [vmem:[#allocation5 + $0x8] sm:$0xff]   ;;  %v506_v2 = vld [vmem:[#allocation5] sm:$0xff]  }
  0x34   :  { %448 = vmatprep.subr.bf16.mxu0 %v641_v0  ;;  %452 = vmatprep.mubr.msk.bf16.mxu0 %vm642_vm0, %v641_v0  ;;  %v81_v3 = vld [vmem:[#allocation2] sm:$0xff]  ;;  %v507_v4 = vld [vmem:[#allocation7 + $0x38] sm:$0xff]   ;;  %v508_v6 = vld [vmem:[#allocation7 + $0x30] sm:$0xff]   ;;  %vm106_vm1 = vcmask 261120  }
  0x35   :  { %456 = vmatprep.subr.bf16.mxu1 %v641_v0  ;;  %472 = vmatprep.mubr.msk.bf16.mxu1 %vm642_vm0, %v641_v0  ;;  %v82_v5 = vpack.c.bf16 %v81_v3, %v81_v3  ;;  %v509_v7 = vld [vmem:[#allocation7 + $0x28] sm:$0xff]   ;;  %v510_v8 = vld [vmem:[#allocation7 + $0x20] sm:$0xff]   ;;  %v511_v9 = vld [vmem:[#allocation7 + $0x18] sm:$0xff]  }
  0x36   :  { %449 = vmatpush3.bf16.msra.mxu0 %v505_v1  ;;  %457 = vmatpush3.bf16.msra.mxu1 %v507_v4  ;;  %v512_v10 = vld [vmem:[#allocation7 + $0x10] sm:$0xff]   ;;  %v513_v11 = vld [vmem:[#allocation7 + $0x8] sm:$0xff]   ;;  %v514_v12 = vld [vmem:[#allocation7] sm:$0xff]  }
  0x37   :  { %450 = vmatprep.subr.bf16.mxu0 %v641_v0  ;;  %458 = vmatprep.subr.bf16.mxu1 %v641_v0  ;;  %v515_v13 = vld [vmem:[#allocation8 + $0x38] sm:$0xff]   ;;  %v516_v14 = vld [vmem:[#allocation8 + $0x30] sm:$0xff]   ;;  %v517_v15 = vld [vmem:[#allocation8 + $0x28] sm:$0xff]  }
  0x38   :  { %v518_v16 = vld [vmem:[#allocation8 + $0x20] sm:$0xff]   ;;  %v519_v17 = vld [vmem:[#allocation8 + $0x18] sm:$0xff]   ;;  %v520_v18 = vld [vmem:[#allocation8 + $0x10] sm:$0xff]  }
  0x39   :  { %v405_v19 = vld [vmem:[%s743_s2] ss:$0 sm:$0xff]  ;;  %v522_v27 = vld [vmem:[#allocation8] sm:$0xff]  }
  0x3a   :  { %451 = vmatpush3.bf16.msra.mxu0 %v506_v2  ;;  %459 = vmatpush3.bf16.msra.mxu1 %v508_v6  ;;  %v521_v26 = vld [vmem:[#allocation8 + $0x8] sm:$0xff]  }
  0x3b   :  { %476 = vmatprep.subr.bf16.mxu0 %v641_v0  ;;  %460 = vmatprep.subr.bf16.mxu1 %v641_v0  ;;  %v409_v28 = vld [vmem:[%s745_s4] ss:$0 sm:$0xff]  ;;  %s643_s4 = smov [#allocation10]  }
  0x3c   :  { %v418_v36 = vld [vmem:[%s747_s6] ss:$0 sm:$0xff]  ;;  %s394_s24 = sshll.u32 %s643_s4, 4  ;;  %s395_s24 = int_to_ptr.vmem [resolvable:$true] %s394_s24 }
  0x3d   :  { %453 = vmatmul.mubr.msk.bf16.vlgmr.msra.gmra.mxu0 %vm106_vm1, %v82_v5  ;;  %s607_s6 = scalar_lea.vmem %s395_s24, 128  ;;  %p612_p7 = scmp.lt.s32.totalorder %s395_s24, %s395_s24 }
  0x3e   :  { %492 = vmatprep.mubr.msk.bf16.mxu0 %vm642_vm0, %v641_v0  ;;  %461 = vmatpush3.bf16.msra.mxu1 %v509_v7  ;;  %p608_p6 = scmp.ne.s32.totalorder %s395_s24, %s607_s6  ;;  %p613_p8 = scmp.lt.s32.totalorder %s607_s6, %s607_s6 }
  0x3f   :  { %462 = vmatprep.subr.bf16.mxu1 %v641_v0  ;;  %477 = vmatpush3.bf16.msra.mxu0 %v515_v13 }
  0x40   :  { %478 = vmatprep.subr.bf16.mxu0 %v641_v0  ;;  %p614_p9 = por %p613_p8, %p612_p7 }
  0x42   :  { %463 = vmatpush3.bf16.msra.mxu1 %v510_v8  ;;  %p615_p10 = pnand %p614_p9, %p608_p6 }
  0x43   :  { %464 = vmatprep.subr.bf16.mxu1 %v641_v0  ;;  %479 = vmatpush3.bf16.msra.mxu0 %v516_v14 }
  0x44   :  { %480 = vmatprep.subr.bf16.mxu0 %v641_v0 }
  0x46   :  { %465 = vmatpush3.bf16.msra.mxu1 %v511_v9 }
  0x47   :  { %466 = vmatprep.subr.bf16.mxu1 %v641_v0  ;;  %481 = vmatpush3.bf16.msra.mxu0 %v517_v15 }
  0x48   :  { %482 = vmatprep.subr.bf16.mxu0 %v641_v0 }
  0x4a   :  { %467 = vmatpush3.bf16.msra.mxu1 %v512_v10 }
  0x4b   :  { %468 = vmatprep.subr.bf16.mxu1 %v641_v0  ;;  %483 = vmatpush3.bf16.msra.mxu0 %v518_v16 }
  0x4c   :  { %484 = vmatprep.subr.bf16.mxu0 %v641_v0 }
  0x4e   :  { %469 = vmatpush3.bf16.msra.mxu1 %v513_v11 }
  0x4f   :  { %470 = vmatprep.subr.bf16.mxu1 %v641_v0  ;;  %485 = vmatpush3.bf16.msra.mxu0 %v519_v17 }
  0x50   :  { %486 = vmatprep.subr.bf16.mxu0 %v641_v0 }
  0x52   :  { %471 = vmatpush3.bf16.msra.mxu1 %v514_v12 }
  0x53   :  { %487 = vmatpush3.bf16.msra.mxu0 %v520_v18 }
  0x54   :  { %488 = vmatprep.subr.bf16.mxu0 %v641_v0 }
  0x57   :  { %489 = vmatpush3.bf16.msra.mxu0 %v521_v26 }
  0x58   :  { %490 = vmatprep.subr.bf16.mxu0 %v641_v0 }
  0x5b   :  { %491 = vmatpush3.bf16.msra.mxu0 %v522_v27 }
  0xfd   :  { %v144_v20 = vpop.f32.mrf.mxu0 }
  0xfe   :  { %v145_v21 = vadd.f32 %v405_v19, %v144_v20 }
  0xff   :  { %v454_v22 = vpop.f32.mrf.mxu0 }
 0x100   :  { %v150_v23 = vpack.c.bf16 %v145_v21, %v145_v21 }
 0x101   :  { %v147_v24 = vpop.f32.mrf.mxu0 }
 0x102   :  { %473 = vmatmul.mubr.bf16.vlgmr.msra.gmra.mxu1 %v150_v23 }
 0x103   :  { %v455_v25 = vpop.f32.mrf.mxu0 }
 0x1c2   :  { %v256_v29 = vpop.f32.mrf.mxu1 }
 0x1c3   :  { %v257_v30 = vadd.f32 %v409_v28, %v256_v29 }
 0x1c4   :  { %v474_v31 = vpop.f32.mrf.mxu1 }
 0x1c5   :  { %v262_v32 = vmax.f32 %v257_v30, 0.0 }
 0x1c6   :  { %v259_v33 = vpop.f32.mrf.mxu1 }
 0x1c7   :  { %v263_v34 = vpack.c.bf16 %v262_v32, %v262_v32 }
 0x1c8   :  { %v475_v35 = vpop.f32.mrf.mxu1 }
 0x1c9   :  { %493 = vmatmul.mubr.bf16.vlgmr.msra.gmra.mxu0 %v263_v34 }
 0x289   :  { %v369_v37 = vpop.f32.mrf.mxu0 }
 0x28a   :  { %v370_v38 = vadd.f32 %v418_v36, %v369_v37 }
 0x28b   :  { %v494_v39 = vpop.f32.mrf.mxu0 }
 0x28c   :  { %375 = vmax.xlane.f32.xlu0 %v370_v38 }
 0x28d   :  { %v372_v40 = vpop.f32.mrf.mxu0 }
 0x28f   :  { %v495_v41 = vpop.f32.mrf.mxu0 }
 0x315   :  { %v376_v42 = vpop.xlane.xlu0 %375 }
 0x316   :  { %v377_v43 = vsub.f32 %v370_v38, %v376_v42 }
 0x318   :  { %v378_v44 = vmul.f32 1.442695, %v377_v43 }
 0x31a   :  { %523 = vpow2.f32 %v378_v44 }
 0x327   :  { %v524_v45 = vpop.eup %523 }
 0x328   :  { %380 = vadd.xlane.f32.xlu0 %v524_v45 }
 0x3b1   :  { %v381_v46 = vpop.xlane.xlu0 %380 }
 0x3b2   :  { %525 = vrcp.f32 %v381_v46 }
 0x3bf   :  { %v526_v47 = vpop.eup %525 }
 0x3c0   :  { %v383_v48 = vmul.f32 %v526_v47, %v381_v46 }
 0x3c2   :  { %v384_v49 = vsub.f32 2.0, %v383_v48 }
 0x3c4   :  { %v385_v50 = vmul.f32 %v526_v47, %v384_v49 }
 0x3c6   :  { %v386_v51 = vmul.f32 %v524_v45, %v385_v50 }
 0x3c8   :  { %387 = vst [vmem:[#allocation10] sm:$0xff] %v386_v51 }
 0x3c9   :  { %618 = shalt.err (!%p615_p10)
}
 0x3ca   :  { %397 = dma.vmem_to_hbm [thread:$0]  %s395_s24, 128, %s748_s7, [#allocation4]  }
 0x3cb   :  { %633 = dma.done.wait [#allocation4], 128  }
 0x3cc   :  { %634 = vsyncadd [#allocation4], 4294967168 }
 0x3cd   :  { %401 = vsyncpa [#allocation3], 1 }
 0x3ce   :  { %402 = vsyncpa [#allocation6], 1 }
 0x3cf   :  { %403 = vsyncpa [#allocation9], 1 }
 0x3d0   :  { %404 = vsyncpa [#allocation4], 1 }

</bundles_post_ra>
